<compile_context>
chip_gen: v5e
topology: v5e:2x2
jax: 0.10.0
libtpu: 0.0.40
codegen_flags: <defaults>
</compile_context>

<pallas_src>
import jax
import jax.numpy as jnp
from jax.experimental import pallas as pl
from jax.experimental.pallas import tpu as pltpu

HIDDEN = 4096          # fixed by the module definition ([state_dim, 4096, 1])
NUM_HEADS = 3          # sell, buy, do_nothing


def ffn_q_kernel(x_ref, w1_ref, b1_ref, w2_ref, b2_ref, o_ref, acc_ref):
    """Grid = (head j, state-dim tile k).

    x_ref  : (B, TILE_D)          bf16   block of the input along D
    w1_ref : (1, TILE_D, HIDDEN)  bf16   contiguous slab of head j's W1
    b1_ref : (1, 1, HIDDEN)       f32
    w2_ref : (1, 1, HIDDEN)       f32    second Linear (out_features == 1)
    b2_ref : (1, 1, 1)            f32
    o_ref  : (1, B, 1)            f32    per-head output block
    acc_ref: (B, HIDDEN)          f32    pre-activation accumulator (over k)
    """
    k = pl.program_id(1)
    nk = pl.num_programs(1)

    @pl.when(k == 0)
    def _init():
        acc_ref[...] = jnp.zeros_like(acc_ref)

    # First Linear restricted to this contiguous (TILE_D, HIDDEN) W1 slab:
    # bf16 operands, f32 MXU accumulation.
    acc_ref[...] += jnp.dot(x_ref[...], w1_ref[0],
                            preferred_element_type=jnp.float32)

    @pl.when(k == nk - 1)
    def _finalize():
        h = jnp.maximum(acc_ref[...] + b1_ref[0], 0.0)          # (B, HIDDEN)
        q = jnp.sum(h * w2_ref[0], axis=-1, keepdims=True)      # (B, 1)
        o_ref[...] = (q + b2_ref[0, 0, 0])[None].astype(o_ref.dtype)


def _choose_tile_d(d, target_bytes=8 << 20):
    """Depth of the contiguous (tile_d, HIDDEN) W1 slab along state_dim.

    Small-D fast path: take all of D (one grid step per head).  Otherwise the
    largest multiple-of-128 divisor of D whose bf16 slab fits target_bytes
    per pipeline buffer (128-multiple keeps the x block lane-legal).
    """
    if d * HIDDEN * 2 <= target_bytes:
        return d
    best = None
    t = 128
    while t <= d:
        if d % t == 0 and t * HIDDEN * 2 <= target_bytes:
            best = t
        t += 128
    return best if best is not None else d


def ffn_fix_fol_q(state, w1, b1, w2, b2, *, tile_d=None):
    """state: (B, D) f32 -> (B, 3) f32.

    Weight layout (transposed vs PyTorch so matmuls are lane-major):
      w1: (3, D, HIDDEN)  (ideally stored bf16)   b1: (3, HIDDEN) f32
      w2: (3, HIDDEN) f32                          b2: (3,) f32
    """
    B, D = state.shape
    assert w1.shape == (NUM_HEADS, D, HIDDEN)
    if tile_d is None:
        tile_d = _choose_tile_d(D)
    assert D % tile_d == 0
    num_d_tiles = D // tile_d

    # W1 dominates HBM traffic: stream it (and x) as bf16, accumulate in f32.
    # (Deviation from the pure-f32 PyTorch module; acceptable for a Q-head.)
    x_bf16 = state.astype(jnp.bfloat16)
    w1_bf16 = w1.astype(jnp.bfloat16)
    # Reshape small per-head vectors so block shapes obey the (8, 128) rule.
    b1_r = b1.reshape(NUM_HEADS, 1, HIDDEN).astype(jnp.float32)
    w2_r = w2.reshape(NUM_HEADS, 1, HIDDEN).astype(jnp.float32)
    b2_r = b2.reshape(NUM_HEADS, 1, 1).astype(jnp.float32)

    slab_bytes = tile_d * HIDDEN * 2
    vmem_need = (2 * slab_bytes              # double-buffered W1 slabs
                 + 2 * B * tile_d * 2        # double-buffered x blocks
                 + 4 * HIDDEN * 4            # b1 / w2 blocks (x2 buffers)
                 + B * HIDDEN * 4            # f32 accumulator
                 + (4 << 20))                # headroom
    vmem_limit = int(min(max(vmem_need, 32 << 20), 96 << 20))

    flops = 2 * NUM_HEADS * B * D * HIDDEN + 3 * NUM_HEADS * B * HIDDEN
    bytes_accessed = (w1_bf16.size * 2 + NUM_HEADS * x_bf16.size * 2
                      + (b1_r.size + w2_r.size + b2_r.size) * 4
                      + NUM_HEADS * B * 4)

    out = pl.pallas_call(
        ffn_q_kernel,
        out_shape=jax.ShapeDtypeStruct((NUM_HEADS, B, 1), jnp.float32),
        grid_spec=pltpu.PrefetchScalarGridSpec(
            num_scalar_prefetch=0,
            grid=(NUM_HEADS, num_d_tiles),
            in_specs=[
                pl.BlockSpec((B, tile_d), lambda j, k: (0, k)),             # x
                pl.BlockSpec((1, tile_d, HIDDEN), lambda j, k: (j, k, 0)),  # W1
                pl.BlockSpec((1, 1, HIDDEN), lambda j, k: (j, 0, 0)),       # b1
                pl.BlockSpec((1, 1, HIDDEN), lambda j, k: (j, 0, 0)),       # w2
                pl.BlockSpec((1, 1, 1), lambda j, k: (j, 0, 0)),            # b2
            ],
            out_specs=pl.BlockSpec((1, B, 1), lambda j, k: (j, 0, 0)),
            scratch_shapes=[pltpu.VMEM((B, HIDDEN), jnp.float32)],
        ),
        compiler_params=pltpu.CompilerParams(
            # Head axis can split across TensorCores; D is the sequential
            # reduction axis (accumulator + constant output block index).
            dimension_semantics=("parallel", "arbitrary"),
            vmem_limit_bytes=vmem_limit,
        ),
        cost_estimate=pl.CostEstimate(
            flops=int(flops), transcendentals=0,
            bytes_accessed=int(bytes_accessed)),
    )(x_bf16, w1_bf16, b1_r, w2_r, b2_r)

    # (NUM_HEADS, B, 1) -> (B, NUM_HEADS), matching torch.cat([...], -1).
    return out[:, :, 0].T


def reference_f32(state, w1, b1, w2, b2):
    """Pure-JAX f32 reference matching the PyTorch module exactly."""
    outs = []
    for j in range(NUM_HEADS):
        h = jnp.maximum(state @ w1[j] + b1[j], 0.0)
        outs.append(jnp.sum(h * w2[j], axis=-1, keepdims=True) + b2[j])
    return jnp.concatenate(outs, axis=-1)


def reference_bf16(state, w1, b1, w2, b2):
    """Reference mimicking kernel numerics (bf16 x/W1, f32 accumulation)."""
    xb = state.astype(jnp.bfloat16)
    w1b = w1.astype(jnp.bfloat16)
    outs = []
    for j in range(NUM_HEADS):
        h = jnp.dot(xb, w1b[j], preferred_element_type=jnp.float32) + b1[j]
        h = jnp.maximum(h, 0.0)
        outs.append(jnp.sum(h * w2[j], axis=-1, keepdims=True) + b2[j])
    return jnp.concatenate(outs, axis=-1)


def init_params(key, state_dim):
    """Deterministic synthetic parameters (PyTorch-Linear-like uniform init)."""
    k1, k2, k3, k4 = jax.random.split(key, 4)
    lim1 = 1.0 / jnp.sqrt(state_dim)
    lim2 = 1.0 / jnp.sqrt(HIDDEN)
    w1 = jax.random.uniform(k1, (NUM_HEADS, state_dim, HIDDEN),
                            jnp.float32, -lim1, lim1)
    b1 = jax.random.uniform(k2, (NUM_HEADS, HIDDEN), jnp.float32, -lim1, lim1)
    w2 = jax.random.uniform(k3, (NUM_HEADS, HIDDEN), jnp.float32, -lim2, lim2)
    b2 = jax.random.uniform(k4, (NUM_HEADS,), jnp.float32, -lim2, lim2)
    return w1, b1, w2, b2


if __name__ == "__main__":
    key = jax.random.PRNGKey(0)
    k_state, k_params = jax.random.split(key)

    batch, state_dim = 8, 32
    state = jax.random.normal(k_state, (batch, state_dim), jnp.float32)
    w1, b1, w2, b2 = init_params(k_params, state_dim)

    # Weights would normally be stored in bf16 once; cast up-front here so the
    # in-wrapper cast is a no-op.
    w1_stream = w1.astype(jnp.bfloat16)

    out = ffn_fix_fol_q(state, w1_stream, b1, w2, b2)
    out = jax.block_until_ready(out)
    assert out.shape == (batch, NUM_HEADS), out.shape

    # Tight check vs a reference with matching mixed precision.
    ref_bf16 = reference_bf16(state, w1, b1, w2, b2)
    assert jnp.allclose(out, ref_bf16, atol=1e-2, rtol=1e-2), (out, ref_bf16)

    # Loose check vs the exact-f32 module semantics (bf16 weight rounding).
    ref_f32 = reference_f32(state, w1, b1, w2, b2)
    assert jnp.allclose(out, ref_f32, atol=3e-2, rtol=3e-2), (out, ref_f32)

    print("KERNEL_OK")
</pallas_src>

<mosaic_0001>
module attributes {stable_mosaic.version = 11 : i64} {
  func.func @ffn_q_kernel(%arg0: i32, %arg1: i32, %arg2: memref<8x32xbf16, #tpu.memory_space<vmem>>, %arg3: memref<1x32x4096xbf16, #tpu.memory_space<vmem>>, %arg4: memref<1x1x4096xf32, #tpu.memory_space<vmem>>, %arg5: memref<1x1x4096xf32, #tpu.memory_space<vmem>>, %arg6: memref<1x1x1xf32, #tpu.memory_space<vmem>>, %arg7: memref<1x8x1xf32, #tpu.memory_space<vmem>>, %arg8: memref<8x4096xf32, #tpu.memory_space<vmem>>) attributes {dimension_semantics = [#tpu.dimension_semantics<parallel>, #tpu.dimension_semantics<arbitrary>], iteration_bounds = array<i64: 3, 1>, scalar_prefetch = 0 : i64, scratch_operands = 1 : i64, tpu.core_type = #tpu.core_type<tc>, window_params = [{transform_indices = @transform_0, window_bounds = array<i64: 8, 32>}, {transform_indices = @transform_1, window_bounds = array<i64: 1, 32, 4096>}, {transform_indices = @transform_2, window_bounds = array<i64: 1, 1, 4096>}, {transform_indices = @transform_3, window_bounds = array<i64: 1, 1, 4096>}, {transform_indices = @transform_4, window_bounds = array<i64: 1, 1, 1>}, {transform_indices = @transform_5, window_bounds = array<i64: 1, 8, 1>}]} {
    %c0_i32 = arith.constant 0 : i32
    %0 = arith.cmpi eq, %arg1, %c0_i32 : i32
    %1 = arith.extui %0 : i1 to i32
    %c0_i32_0 = arith.constant 0 : i32
    %2 = arith.cmpi ne, %1, %c0_i32_0 : i32
    scf.if %2 {
      %cst_11 = arith.constant 0.000000e+00 : f32
      %13 = vector.broadcast %cst_11 : f32 to vector<8x4096xf32>
      %c0_12 = arith.constant 0 : index
      %c0_13 = arith.constant 0 : index
      %14 = vector.load %arg8[%c0_12, %c0_13] : memref<8x4096xf32, #tpu.memory_space<vmem>>, vector<8x4096xf32>
      tpu.vector_store %arg8[%c0_12, %c0_13], %13 {strides = array<i32>} : memref<8x4096xf32, #tpu.memory_space<vmem>>, vector<8x4096xf32>,
    } else {
    }
    %c0 = arith.constant 0 : index
    %c0_1 = arith.constant 0 : index
    %3 = vector.load %arg8[%c0, %c0_1] : memref<8x4096xf32, #tpu.memory_space<vmem>>, vector<8x4096xf32>
    %c0_2 = arith.constant 0 : index
    %c0_3 = arith.constant 0 : index
    %4 = vector.load %arg2[%c0_2, %c0_3] : memref<8x32xbf16, #tpu.memory_space<vmem>>, vector<8x32xbf16>
    %c0_4 = arith.constant 0 : index
    %c0_5 = arith.constant 0 : index
    %c0_6 = arith.constant 0 : index
    %5 = vector.load %arg3[%c0_4, %c0_5, %c0_6] : memref<1x32x4096xbf16, #tpu.memory_space<vmem>>, vector<1x32x4096xbf16>
    %6 = vector.shape_cast %5 : vector<1x32x4096xbf16> to vector<32x4096xbf16>
    %cst = arith.constant dense<0.000000e+00> : vector<8x4096xf32>
    %7 = tpu.matmul %4, %6, %cst {dimension_numbers = #tpu.dot_dimension_numbers<[1], [0], [0], [1], [0, 0, 1, 1], [], []>} : vector<8x32xbf16>, vector<32x4096xbf16>, vector<8x4096xf32> -> vector<8x4096xf32>
    %8 = arith.addf %3, %7 : vector<8x4096xf32>
    %c0_7 = arith.constant 0 : index
    %c0_8 = arith.constant 0 : index
    %9 = vector.load %arg8[%c0_7, %c0_8] : memref<8x4096xf32, #tpu.memory_space<vmem>>, vector<8x4096xf32>
    tpu.vector_store %arg8[%c0_7, %c0_8], %8 {strides = array<i32>} : memref<8x4096xf32, #tpu.memory_space<vmem>>, vector<8x4096xf32>,
    %c0_i32_9 = arith.constant 0 : i32
    %10 = arith.cmpi eq, %arg1, %c0_i32_9 : i32
    %11 = arith.extui %10 : i1 to i32
    %c0_i32_10 = arith.constant 0 : i32
    %12 = arith.cmpi ne, %11, %c0_i32_10 : i32
    scf.if %12 {
      %c0_11 = arith.constant 0 : index
      %c0_12 = arith.constant 0 : index
      %13 = vector.load %arg8[%c0_11, %c0_12] : memref<8x4096xf32, #tpu.memory_space<vmem>>, vector<8x4096xf32>
      %c0_13 = arith.constant 0 : index
      %c0_14 = arith.constant 0 : index
      %c0_15 = arith.constant 0 : index
      %14 = vector.load %arg4[%c0_13, %c0_14, %c0_15] : memref<1x1x4096xf32, #tpu.memory_space<vmem>>, vector<1x1x4096xf32>
      %15 = vector.shape_cast %14 : vector<1x1x4096xf32> to vector<1x4096xf32>
      %16 = vector.broadcast %15 : vector<1x4096xf32> to vector<8x4096xf32>
      %17 = arith.addf %13, %16 : vector<8x4096xf32>
      %cst_16 = arith.constant 0.000000e+00 : f32
      %18 = vector.broadcast %cst_16 : f32 to vector<8x4096xf32>
      %19 = arith.maximumf %17, %18 : vector<8x4096xf32>
      %c0_17 = arith.constant 0 : index
      %c0_18 = arith.constant 0 : index
      %c0_19 = arith.constant 0 : index
      %20 = vector.load %arg5[%c0_17, %c0_18, %c0_19] : memref<1x1x4096xf32, #tpu.memory_space<vmem>>, vector<1x1x4096xf32>
      %21 = vector.shape_cast %20 : vector<1x1x4096xf32> to vector<1x4096xf32>
      %22 = vector.broadcast %21 : vector<1x4096xf32> to vector<8x4096xf32>
      %23 = arith.mulf %19, %22 : vector<8x4096xf32>
      %cst_20 = arith.constant dense<0.000000e+00> : vector<8xf32>
      %24 = vector.multi_reduction <add>, %23, %cst_20 [1] : vector<8x4096xf32> to vector<8xf32>
      %25 = vector.shape_cast %24 : vector<8xf32> to vector<8x1xf32>
      %c0_21 = arith.constant 0 : index
      %c0_22 = arith.constant 0 : index
      %c0_23 = arith.constant 0 : index
      %26 = vector.load %arg6[%c0_21, %c0_22, %c0_23] : memref<1x1x1xf32, #tpu.memory_space<vmem>>, vector<1x1x1xf32>
      %27 = vector.extract %26[0, 0, 0] : f32 from vector<1x1x1xf32>
      %28 = vector.broadcast %27 : f32 to vector<8x1xf32>
      %29 = arith.addf %25, %28 : vector<8x1xf32>
      %30 = vector.shape_cast %29 : vector<8x1xf32> to vector<1x8x1xf32>
      %c0_24 = arith.constant 0 : index
      %c0_25 = arith.constant 0 : index
      %c0_26 = arith.constant 0 : index
      %31 = vector.load %arg7[%c0_24, %c0_25, %c0_26] : memref<1x8x1xf32, #tpu.memory_space<vmem>>, vector<1x8x1xf32>
      tpu.vector_store %arg7[%c0_24, %c0_25, %c0_26], %30 {strides = array<i32>} : memref<1x8x1xf32, #tpu.memory_space<vmem>>, vector<1x8x1xf32>,
    } else {
    }
    return
  }
  func.func @transform_0(%arg0: i32, %arg1: i32) -> (i32, i32) {
    %c0_i32 = arith.constant 0 : i32
    %c0_i32_0 = arith.constant 0 : i32
    return %c0_i32, %arg1 : i32, i32
  }
  func.func @transform_1(%arg0: i32, %arg1: i32) -> (i32, i32, i32) {
    %c0_i32 = arith.constant 0 : i32
    %c0_i32_0 = arith.constant 0 : i32
    return %arg0, %arg1, %c0_i32 : i32, i32, i32
  }
  func.func @transform_2(%arg0: i32, %arg1: i32) -> (i32, i32, i32) {
    %c0_i32 = arith.constant 0 : i32
    %c0_i32_0 = arith.constant 0 : i32
    %c0_i32_1 = arith.constant 0 : i32
    return %arg0, %c0_i32, %c0_i32_0 : i32, i32, i32
  }
  func.func @transform_3(%arg0: i32, %arg1: i32) -> (i32, i32, i32) {
    %c0_i32 = arith.constant 0 : i32
    %c0_i32_0 = arith.constant 0 : i32
    %c0_i32_1 = arith.constant 0 : i32
    return %arg0, %c0_i32, %c0_i32_0 : i32, i32, i32
  }
  func.func @transform_4(%arg0: i32, %arg1: i32) -> (i32, i32, i32) {
    %c0_i32 = arith.constant 0 : i32
    %c0_i32_0 = arith.constant 0 : i32
    %c0_i32_1 = arith.constant 0 : i32
    return %arg0, %c0_i32, %c0_i32_0 : i32, i32, i32
  }
  func.func @transform_5(%arg0: i32, %arg1: i32) -> (i32, i32, i32) {
    %c0_i32 = arith.constant 0 : i32
    %c0_i32_0 = arith.constant 0 : i32
    %c0_i32_1 = arith.constant 0 : i32
    return %arg0, %c0_i32, %c0_i32_0 : i32, i32, i32
  }
}

</mosaic_0001>

<bundles_post_ra>
// kernel: tpu_custom_call.1
= control target key start
LH: loop header
LB: loop body
LE: loop exit
PB: predicated region body
PF: predicated region fallthrough
CT: control target
= control target key end

     0   :  { %s2803_s0 = inlined_call_operand.vmem [shape: bf16[8,32], index: 0, kind: input, shape index: {}]   ;;  %s2804_s1 = inlined_call_operand.hbm [shape: bf16[3,32,4096], index: 1, kind: input, shape index: {}]   ;;  %s2805_s2 = inlined_call_operand.hbm [shape: f32[3,1,4096], index: 2, kind: input, shape index: {}]   ;;  %s2806_s3 = inlined_call_operand.hbm [shape: f32[3,1,4096], index: 3, kind: input, shape index: {}]   ;;  %s2807_s4 = inlined_call_operand.vmem [shape: f32[3,1,1], index: 4, kind: input, shape index: {}]   ;;  %s2808_s5 = inlined_call_operand.vmem [shape: f32[3,8,1], index: 5, kind: output, shape index: {}]  }
   0x1   :  { %2812 = sst [smem:[#allocation11_spill]] %s2805_s2 }
   0x2   :  { %2813 = sst [smem:[#allocation12_spill]] %s2806_s3 }
   0x3   :  { %10 = vsyncpa [#allocation4], 0 }
   0x4   :  { %12 = vsyncpa [#allocation4 + $0x1], 0 }
   0x5   :  { %13 = vsyncpa [#allocation6], 0 }
   0x6   :  { %15 = vsyncpa [#allocation6 + $0x1], 0  ;;  %s2383_s18 = smov 0   ;;  %s2385_s19 = smov 0  }
   0x7   :  { %s2387_s20 = smov 0   ;;  %s2389_s21 = smov 0  }
   0x8   :  { %s2391_s22 = smov 0   ;;  %s2393_s23 = smov 0  }
   0x9 LB: > { %s2809_s24 = sadd.s32 4294967295, %s2349_s23   ;;  %s33_s25 = sadd.s32 1, %s2345_s22  ;;  %s2349_s23 = sphi %s2393_s23, %s21_s23   ;;  %s2345_s22 = sphi %s2391_s22, %s2827_s22   ;;  %s2341_s21 = sphi %s2389_s21, %s2826_s21   ;;  %s2337_s20 = sphi %s2387_s20, %s2825_s20   ;;  %s2333_s19 = sphi %s2385_s19, %s2824_s19   ;;  %s2329_s18 = sphi %s2383_s18, %s2823_s18  }
   0xa   : > { %p35_p0 = scmp.ge.s32.totalorder %s33_s25, 3  ;;  %s68_s26 = sadd.s32 1, %s2337_s20 }
   0xb   : > { %p75_p1 = scmp.ne.s32.totalorder %s2337_s20, %s2333_s19  ;;  %p76_p2 = scmp.eq.s32.totalorder %s2349_s23, 0 }
   0xc   : > { %s2829_s25 = smov (%p35_p0, %s33_s25), 0  ;;  %p81_p4 = scmp.ne.s32.totalorder %s2333_s19, %s2329_s18 }
   0xd   : > { %2814 = sst [smem:[#allocation10_spill]] %s2829_s25  ;;  %p77_p3 = por %p76_p2, %p75_p1 }
   0xe   : > { %s63_s27 = ssub.s32 %s2345_s22, %s2829_s25  ;;  %p82_p5 = scmp.eq.s32.totalorder %s2809_s24, 0 }
   0xf   : > { %p66_p6 = scmp.eq.s32.totalorder %s63_s27, 0  ;;  %p2154_p8 = scmp.lt.s32.totalorder %s2349_s23, 3 }
  0x10   : > { %p2424_p7 = por %p82_p5, %p81_p4  ;;  %s2433_s30 = sand.u32 1, %s2337_s20  }
  0x11   : > { %s2430_s29 = scalar_select %p66_p6, %s2337_s20, %s68_s26  }
  0x12   : > { %p2435_p9 = pnand %p2154_p8, %p77_p3  ;;  %s241_s7 = sand.u32 1, %s2349_s23  }
  0x13   : > { %s2810_s8 = sshll.u32 %s2433_s30, 5  ;;  %s1773_s9 = sshll.u32 %s2345_s22, 5 }
  0x14   : > { %s2817_s2 = sld [smem:[#allocation11_spill]]  ;;  %s245_s13 = scalar_lea.vmem [#allocation5], %s2810_s8 }
  0x15   : > { %s253_s14 = sshll.u32 %s245_s13, 4  ;;  %s242_s16 = scalar_lea.sflag [#allocation6], %s241_s7  ;;  %s254_s14 = int_to_ptr.vmem [resolvable:$true] %s253_s14 }
  0x16   : > { %s2818_s3 = sld [smem:[#allocation12_spill]]  ;;  %p1776_p10 = scmp.ge.s32.totalorder %s2349_s23, 1 }
  0x17   : > { %p283_p11 = scmp.lt.s32.totalorder %s2349_s23, 4  ;;  %s1769_s10 = sshll.u32 %s2433_s30, 9 }
  0x18   : > { %s2071_s11 = sshll.u32 %s2345_s22, 9  ;;  %s217_s17 = scalar_lea.sflag [#allocation4], %s2433_s30 }
  0x19   : > { %p2454_p12 = pnand %p1776_p10, %p283_p11  ;;  %s228_s7 = scalar_lea.hbm %s2804_s1, %s2071_s11 }
  0x1a   : > { %s249_s12 = scalar_lea.hbm %s2817_s2, %s1773_s9  ;;  %s229_s24 = sshll.u32 %s228_s7, 4  ;;  %s230_s24 = int_to_ptr.hbm [resolvable:$true] %s229_s24 }
  0x1b   : > { %s251_s15 = sshll.u32 %s249_s12, 4  ;;  %s2351_s18 = smov 2048   ;;  %s252_s15 = int_to_ptr.hbm [resolvable:$true] %s251_s15 }
  0x1c   : > { %2150 = dma.hbm_to_vmem [thread:$0]  (!%p2435_p9), %s252_s15, 512, %s254_s14, %s242_s16  }
  0x1d   : > { %s268_s26 = scalar_lea.hbm %s2818_s3, %s1773_s9  ;;  %s220_s14 = scalar_lea.vmem [#allocation3], %s1769_s10 }
  0x1e   : > { %s231_s15 = sshll.u32 %s220_s14, 4  ;;  %s270_s9 = sshll.u32 %s268_s26, 4  ;;  %s232_s15 = int_to_ptr.vmem [resolvable:$true] %s231_s15  ;;  %s271_s9 = int_to_ptr.hbm [resolvable:$true] %s270_s9 }
  0x1f   : > { %s2352_s8 = smov 128   ;;  %s2820_s2 = sshll.u32 %s2433_s30, 5 }
  0x20   : > { %2147 = dma.hbm_to_vmem [thread:$0]  (!%p2435_p9), %s230_s24, 8192, %s232_s15, %s217_s17, %s2351_s18, %s2351_s18, %s2352_s8  }
  0x21   : > { %s264_s3 = scalar_lea.vmem [#allocation7], %s2820_s2  ;;  %287 = sbr.rel (%p2454_p12) target bundleno = 428 (0x1ac), region = 40 }
  0x22   : > { %s272_s25 = sshll.u32 %s264_s3, 4  ;;  %s2473_s10 = sand.u32 (!%p2454_p12), 1, %s2333_s19   ;;  %s273_s25 = int_to_ptr.vmem [resolvable:$true] %s272_s25 }
  0x23   : > { %2153 = dma.hbm_to_vmem [thread:$0]  (!%p2435_p9), %s271_s9, 512, %s273_s25, %s242_s16  }
  0x24   : > { %s1777_s26 = sshll.u32 (!%p2454_p12), %s2473_s10, 9  ;;  %s290_s11 = scalar_lea.sflag (!%p2454_p12), [#allocation4], %s2473_s10 }
  0x25   : > { %s2477_s12 = scalar_lea.vmem (!%p2454_p12), [#allocation3], %s1777_s26 }
  0x26   : > { %2320 = dma.done.wait (%p2424_p7), %s290_s11, 8192  }
  0x27   : > { %2322 = vsyncadd (%p2424_p7), %s290_s11, 4294959104  ;;  %s2821_s2 = sadd.s32 4294967295, %s2349_s23   ;;  %s1778_s24 = sshll.u32 %s2473_s10, 5 }
  0x28   : > { %s299_s3 = sand.u32 1, %s2821_s2   ;;  %s2488_s30 = scalar_lea.vmem [#allocation5], %s1778_s24 }
  0x29   : > { %s300_s25 = scalar_lea.sflag [#allocation6], %s299_s3 }
  0x2a   : > { %2324 = dma.done.wait (%p2424_p7), %s300_s25, 1024  }
  0x2b   : > { %2326 = vsyncadd (%p2424_p7), %s300_s25, 4294966272  ;;  %vm823_vm0 = vcmask 261120   ;;  %v1911_v0 = vld [vmem:[%s2477_s12 + $0x100] sm:$0xf]  ;;  %v2104_v2 = vld [vmem:[%s2477_s12 + $0x104] sm:$0xf] }
  0x2c   : > { %v2120_v1 = vld [vmem:[%s2477_s12 + $0x17c] sm:$0xf0]  ;;  %v1913_v4 = vld [vmem:[%s2477_s12 + $0x180] sm:$0xf0]  ;;  %v1919_v5 = vld [vmem:[%s2477_s12 + $0x108] sm:$0xf] }
  0x2d   : > { %v1912_v3 = vor.u32 %v2120_v1, %v1911_v0  ;;  %v2121_v6 = vld [vmem:[%s2477_s12 + $0x184] sm:$0xf0]  ;;  %v1916_v7 = vor.u32 %v2104_v2, %v1913_v4  ;;  %v2105_v9 = vld [vmem:[%s2477_s12 + $0x10c] sm:$0xf]  ;;  %v1783_v11 = vld [vmem:[%s2477_s12] sm:$0xf] }
  0x2e   : > { %v1920_v8 = vor.u32 %v2121_v6, %v1919_v5  ;;  %v1921_v10 = vld [vmem:[%s2477_s12 + $0x188] sm:$0xf0]  ;;  %v2088_v13 = vld [vmem:[%s2477_s12 + $0x7c] sm:$0xf0]  ;;  %v2072_v14 = vld [vmem:[%s2477_s12 + $0x4] sm:$0xf] }
  0x2f   : > { %833 = vmatpush.bf16.msra.mxu0 %v1912_v3  ;;  %v1924_v12 = vor.u32 %v2105_v9, %v1921_v10  ;;  %v1785_v15 = vld [vmem:[%s2477_s12 + $0x80] sm:$0xf0]  ;;  %846 = vmatpush.bf16.msra.mxu1 %v1916_v7  ;;  %v1784_v16 = vor.u32 %v2088_v13, %v1783_v11  ;;  %v1791_v18 = vld [vmem:[%s2477_s12 + $0x8] sm:$0xf]  ;;  %v2073_v20 = vld [vmem:[%s2477_s12 + $0xc] sm:$0xf] }
  0x30   : > { %859 = vmatpush.bf16.msra.mxu2 %v1920_v8  ;;  %v1788_v17 = vor.u32 %v2072_v14, %v1785_v15  ;;  %v2089_v19 = vld [vmem:[%s2477_s12 + $0x84] sm:$0xf0]  ;;  %v1793_v22 = vld [vmem:[%s2477_s12 + $0x88] sm:$0xf0]  ;;  %v2513_v23 = vld [vmem:[%s2803_s0] sm:$0xf] }
  0x31   : > { %872 = vmatpush.bf16.msra.mxu3 %v1924_v12  ;;  %v1792_v21 = vor.u32 %v2089_v19, %v1791_v18  ;;  %v1935_v24 = vld [vmem:[%s2477_s12 + $0x118] sm:$0xf]  ;;  %v1796_v25 = vor.u32 %v2073_v20, %v1793_v22  ;;  %v1927_v27 = vld [vmem:[%s2477_s12 + $0x110] sm:$0xf]  ;;  %v2107_v30 = vld [vmem:[%s2477_s12 + $0x11c] sm:$0xf] }
  0x32   : > { %v2123_v26 = vld [vmem:[%s2477_s12 + $0x194] sm:$0xf0]  ;;  %v2122_v28 = vld [vmem:[%s2477_s12 + $0x18c] sm:$0xf0]  ;;  %v1937_v31 = vld [vmem:[%s2477_s12 + $0x198] sm:$0xf0] }
  0x33   : > { %834 = vmatpush.bf16.msra.mxu0 %v1784_v16  ;;  %v1936_v29 = vor.u32 %v2123_v26, %v1935_v24  ;;  %v2106_v32 = vld [vmem:[%s2477_s12 + $0x114] sm:$0xf]  ;;  %847 = vmatpush.bf16.msra.mxu1 %v1788_v17  ;;  %v1928_v33 = vor.u32 %v2122_v28, %v1927_v27  ;;  %v1940_v34 = vor.u32 %v2107_v30, %v1937_v31  ;;  %v1807_v36 = vld [vmem:[%s2477_s12 + $0x18] sm:$0xf]  ;;  %v1799_v40 = vld [vmem:[%s2477_s12 + $0x10] sm:$0xf] }
  0x34   : > { %860 = vmatpush.bf16.msra.mxu2 %v1792_v21  ;;  %v1929_v35 = vld [vmem:[%s2477_s12 + $0x190] sm:$0xf0]  ;;  %v2091_v37 = vld [vmem:[%s2477_s12 + $0x94] sm:$0xf0]  ;;  %v2090_v41 = vld [vmem:[%s2477_s12 + $0x8c] sm:$0xf0] }
  0x35   : > { %873 = vmatpush.bf16.msra.mxu3 %v1796_v25  ;;  %v1932_v38 = vor.u32 %v2106_v32, %v1929_v35  ;;  %v1808_v39 = vor.u32 %v2091_v37, %v1807_v36  ;;  %v2075_v42 = vld [vmem:[%s2477_s12 + $0x1c] sm:$0xf]  ;;  %v2074_v44 = vld [vmem:[%s2477_s12 + $0x14] sm:$0xf]  ;;  %v1951_v47 = vld [vmem:[%s2477_s12 + $0x128] sm:$0xf]  ;;  %v1800_v50 = vor.u32 %v2090_v41, %v1799_v40 }
  0x36   : > { %2037 = vmatmul.msk.bf16.vlgmr.msra.gmra.mxu0 %vm823_vm0, %v2513_v23  ;;  %v1809_v43 = vld [vmem:[%s2477_s12 + $0x98] sm:$0xf0]  ;;  %v1801_v45 = vld [vmem:[%s2477_s12 + $0x90] sm:$0xf0]  ;;  %2038 = vmatmul.msk.bf16.vlgmr.msra.gmra.mxu1 %vm823_vm0, %v2513_v23  ;;  %v2125_v48 = vld [vmem:[%s2477_s12 + $0x1a4] sm:$0xf0] }
  0x37   : > { %2039 = vmatmul.msk.bf16.vlgmr.msra.gmra.mxu2 %vm823_vm0, %v2513_v23  ;;  %v1812_v46 = vor.u32 %v2075_v42, %v1809_v43  ;;  %v1943_v49 = vld [vmem:[%s2477_s12 + $0x120] sm:$0xf]  ;;  %885 = vmatpush.bf16.msrb.mxu0 %v1928_v33  ;;  %v1952_v51 = vor.u32 %v2125_v48, %v1951_v47  ;;  %v2109_v53 = vld [vmem:[%s2477_s12 + $0x12c] sm:$0xf]  ;;  %v1804_v55 = vor.u32 %v2074_v44, %v1801_v45  ;;  %v2108_v58 = vld [vmem:[%s2477_s12 + $0x124] sm:$0xf] }
  0x38   : > { %911 = vmatpush.bf16.msrb.mxu2 %v1936_v29  ;;  %2040 = vmatmul.msk.bf16.vlgmr.msra.gmra.mxu3 %vm823_vm0, %v2513_v23  ;;  %v2124_v52 = vld [vmem:[%s2477_s12 + $0x19c] sm:$0xf0]  ;;  %v1953_v54 = vld [vmem:[%s2477_s12 + $0x1a8] sm:$0xf0]  ;;  %v1945_v59 = vld [vmem:[%s2477_s12 + $0x1a0] sm:$0xf0] }
  0x39   : > { %924 = vmatpush.bf16.msrb.mxu3 %v1940_v34  ;;  %898 = vmatpush.bf16.msrb.mxu1 %v1932_v38  ;;  %v1944_v56 = vor.u32 %v2124_v52, %v1943_v49  ;;  %v1956_v57 = vor.u32 %v2109_v53, %v1953_v54  ;;  %v1823_v60 = vld [vmem:[%s2477_s12 + $0x28] sm:$0xf]  ;;  %v1948_v61 = vor.u32 %v2108_v58, %v1945_v59  ;;  %v1815_v63 = vld [vmem:[%s2477_s12 + $0x20] sm:$0xf]  ;;  %v2077_v2 = vld [vmem:[%s2477_s12 + $0x2c] sm:$0xf] }
  0x3a   : > { %v2093_v62 = vld [vmem:[%s2477_s12 + $0xa4] sm:$0xf0]  ;;  %v2092_v0 = vld [vmem:[%s2477_s12 + $0x9c] sm:$0xf0]  ;;  %v1825_v3 = vld [vmem:[%s2477_s12 + $0xa8] sm:$0xf0] }
  0x3b   : > { %v1824_v1 = vor.u32 %v2093_v62, %v1823_v60  ;;  %v2076_v4 = vld [vmem:[%s2477_s12 + $0x24] sm:$0xf]  ;;  %886 = vmatpush.bf16.msrb.mxu0 %v1800_v50  ;;  %v1828_v5 = vor.u32 %v2077_v2, %v1825_v3  ;;  %v1816_v7 = vor.u32 %v2092_v0, %v1815_v63  ;;  %v1967_v9 = vld [vmem:[%s2477_s12 + $0x138] sm:$0xf]  ;;  %v1959_v11 = vld [vmem:[%s2477_s12 + $0x130] sm:$0xf] }
  0x3c   : > { %912 = vmatpush.bf16.msrb.mxu2 %v1808_v39  ;;  %v1817_v6 = vld [vmem:[%s2477_s12 + $0xa0] sm:$0xf0]  ;;  %v2127_v10 = vld [vmem:[%s2477_s12 + $0x1b4] sm:$0xf0]  ;;  %v2126_v12 = vld [vmem:[%s2477_s12 + $0x1ac] sm:$0xf0] }
  0x3d   : > { %925 = vmatpush.bf16.msrb.mxu3 %v1812_v46  ;;  %899 = vmatpush.bf16.msrb.mxu1 %v1804_v55  ;;  %v1820_v8 = vor.u32 %v2076_v4, %v1817_v6  ;;  %v2111_v13 = vld [vmem:[%s2477_s12 + $0x13c] sm:$0xf]  ;;  %v2110_v15 = vld [vmem:[%s2477_s12 + $0x134] sm:$0xf]  ;;  %v1968_v17 = vor.u32 %v2127_v10, %v1967_v9  ;;  %v1960_v18 = vor.u32 %v2126_v12, %v1959_v11  ;;  %v1839_v20 = vld [vmem:[%s2477_s12 + $0x38] sm:$0xf] }
  0x3e   : > { %v1969_v14 = vld [vmem:[%s2477_s12 + $0x1b8] sm:$0xf0]  ;;  %v1961_v16 = vld [vmem:[%s2477_s12 + $0x1b0] sm:$0xf0]  ;;  %v2095_v21 = vld [vmem:[%s2477_s12 + $0xb4] sm:$0xf0] }
  0x3f   : > { %937 = vmatpush.bf16.msra.mxu0 %v1944_v56  ;;  %v1972_v19 = vor.u32 %v2111_v13, %v1969_v14  ;;  %v1831_v22 = vld [vmem:[%s2477_s12 + $0x30] sm:$0xf]  ;;  %v1964_v24 = vor.u32 %v2110_v15, %v1961_v16  ;;  %v2079_v26 = vld [vmem:[%s2477_s12 + $0x3c] sm:$0xf]  ;;  %v2078_v28 = vld [vmem:[%s2477_s12 + $0x34] sm:$0xf]  ;;  %v1840_v30 = vor.u32 %v2095_v21, %v1839_v20 }
  0x40   : > { %963 = vmatpush.bf16.msra.mxu2 %v1952_v51  ;;  %v2094_v25 = vld [vmem:[%s2477_s12 + $0xac] sm:$0xf0]  ;;  %v1841_v27 = vld [vmem:[%s2477_s12 + $0xb8] sm:$0xf0]  ;;  %v1833_v29 = vld [vmem:[%s2477_s12 + $0xb0] sm:$0xf0] }
  0x41   : > { %976 = vmatpush.bf16.msra.mxu3 %v1956_v57  ;;  %950 = vmatpush.bf16.msra.mxu1 %v1948_v61  ;;  %v1832_v31 = vor.u32 %v2094_v25, %v1831_v22  ;;  %v1844_v32 = vor.u32 %v2079_v26, %v1841_v27  ;;  %v1836_v33 = vor.u32 %v2078_v28, %v1833_v29  ;;  %v1983_v34 = vld [vmem:[%s2477_s12 + $0x148] sm:$0xf]  ;;  %v1975_v36 = vld [vmem:[%s2477_s12 + $0x140] sm:$0xf]  ;;  %v2113_v38 = vld [vmem:[%s2477_s12 + $0x14c] sm:$0xf] }
  0x42   : > { %v2129_v35 = vld [vmem:[%s2477_s12 + $0x1c4] sm:$0xf0]  ;;  %v2128_v37 = vld [vmem:[%s2477_s12 + $0x1bc] sm:$0xf0]  ;;  %v1985_v39 = vld [vmem:[%s2477_s12 + $0x1c8] sm:$0xf0] }
  0x43   : > { %938 = vmatpush.bf16.msra.mxu0 %v1816_v7  ;;  %v2112_v40 = vld [vmem:[%s2477_s12 + $0x144] sm:$0xf]  ;;  %v1984_v42 = vor.u32 %v2129_v35, %v1983_v34  ;;  %v1976_v43 = vor.u32 %v2128_v37, %v1975_v36  ;;  %v1988_v44 = vor.u32 %v2113_v38, %v1985_v39  ;;  %v1855_v45 = vld [vmem:[%s2477_s12 + $0x48] sm:$0xf]  ;;  %v1847_v47 = vld [vmem:[%s2477_s12 + $0x40] sm:$0xf] }
  0x44   : > { %964 = vmatpush.bf16.msra.mxu2 %v1824_v1  ;;  %v1977_v41 = vld [vmem:[%s2477_s12 + $0x1c0] sm:$0xf0]  ;;  %v2097_v46 = vld [vmem:[%s2477_s12 + $0xc4] sm:$0xf0]  ;;  %v2096_v49 = vld [vmem:[%s2477_s12 + $0xbc] sm:$0xf0] }
  0x45   : > { %977 = vmatpush.bf16.msra.mxu3 %v1828_v5  ;;  %951 = vmatpush.bf16.msra.mxu1 %v1820_v8  ;;  %v1980_v48 = vor.u32 %v2112_v40, %v1977_v41  ;;  %v2081_v50 = vld [vmem:[%s2477_s12 + $0x4c] sm:$0xf]  ;;  %v2080_v52 = vld [vmem:[%s2477_s12 + $0x44] sm:$0xf]  ;;  %v1856_v54 = vor.u32 %v2097_v46, %v1855_v45  ;;  %v1848_v55 = vor.u32 %v2096_v49, %v1847_v47  ;;  %v1999_v58 = vld [vmem:[%s2477_s12 + $0x158] sm:$0xf] }
  0x46   : > { %2041 = vmatmul.msk.bf16.vlgmr.msrb.gmra.mxu0 %vm823_vm0, %v2513_v23  ;;  %2042 = vmatmul.msk.bf16.vlgmr.msrb.gmra.mxu1 %vm823_vm0, %v2513_v23  ;;  %v1857_v51 = vld [vmem:[%s2477_s12 + $0xc8] sm:$0xf0]  ;;  %v1849_v53 = vld [vmem:[%s2477_s12 + $0xc0] sm:$0xf0]  ;;  %v2131_v59 = vld [vmem:[%s2477_s12 + $0x1d4] sm:$0xf0] }
  0x47   : > { %2043 = vmatmul.msk.bf16.vlgmr.msrb.gmra.mxu2 %vm823_vm0, %v2513_v23  ;;  %989 = vmatpush.bf16.msrb.mxu0 %v1960_v18  ;;  %v1860_v56 = vor.u32 %v2081_v50, %v1857_v51  ;;  %v1852_v57 = vor.u32 %v2080_v52, %v1849_v53  ;;  %v1991_v60 = vld [vmem:[%s2477_s12 + $0x150] sm:$0xf]  ;;  %v2115_v62 = vld [vmem:[%s2477_s12 + $0x15c] sm:$0xf]  ;;  %v2114_v0 = vld [vmem:[%s2477_s12 + $0x154] sm:$0xf]  ;;  %v2000_v2 = vor.u32 %v2131_v59, %v1999_v58 }
  0x48   : > { %2044 = vmatmul.msk.bf16.vlgmr.msrb.gmra.mxu3 %vm823_vm0, %v2513_v23  ;;  %1015 = vmatpush.bf16.msrb.mxu2 %v1968_v17  ;;  %v2130_v61 = vld [vmem:[%s2477_s12 + $0x1cc] sm:$0xf0]  ;;  %v2001_v63 = vld [vmem:[%s2477_s12 + $0x1d8] sm:$0xf0]  ;;  %v1993_v1 = vld [vmem:[%s2477_s12 + $0x1d0] sm:$0xf0] }
  0x49   : > { %1028 = vmatpush.bf16.msrb.mxu3 %v1972_v19  ;;  %1002 = vmatpush.bf16.msrb.mxu1 %v1964_v24  ;;  %v1992_v3 = vor.u32 %v2130_v61, %v1991_v60  ;;  %v2004_v4 = vor.u32 %v2115_v62, %v2001_v63  ;;  %v1871_v5 = vld [vmem:[%s2477_s12 + $0x58] sm:$0xf]  ;;  %v1863_v7 = vld [vmem:[%s2477_s12 + $0x50] sm:$0xf]  ;;  %v1996_v8 = vor.u32 %v2114_v0, %v1993_v1  ;;  %v2083_v10 = vld [vmem:[%s2477_s12 + $0x5c] sm:$0xf] }
  0x4a   : > { %v2099_v6 = vld [vmem:[%s2477_s12 + $0xd4] sm:$0xf0]  ;;  %v2098_v9 = vld [vmem:[%s2477_s12 + $0xcc] sm:$0xf0]  ;;  %v1873_v11 = vld [vmem:[%s2477_s12 + $0xd8] sm:$0xf0] }
  0x4b   : > { %990 = vmatpush.bf16.msrb.mxu0 %v1832_v31  ;;  %v2082_v12 = vld [vmem:[%s2477_s12 + $0x54] sm:$0xf]  ;;  %v1872_v14 = vor.u32 %v2099_v6, %v1871_v5  ;;  %v1864_v15 = vor.u32 %v2098_v9, %v1863_v7  ;;  %v1876_v16 = vor.u32 %v2083_v10, %v1873_v11  ;;  %v2015_v18 = vld [vmem:[%s2477_s12 + $0x168] sm:$0xf]  ;;  %v2007_v20 = vld [vmem:[%s2477_s12 + $0x160] sm:$0xf] }
  0x4c   : > { %1016 = vmatpush.bf16.msrb.mxu2 %v1840_v30  ;;  %v1865_v13 = vld [vmem:[%s2477_s12 + $0xd0] sm:$0xf0]  ;;  %v2133_v19 = vld [vmem:[%s2477_s12 + $0x1e4] sm:$0xf0]  ;;  %v2132_v21 = vld [vmem:[%s2477_s12 + $0x1dc] sm:$0xf0] }
  0x4d   : > { %1029 = vmatpush.bf16.msrb.mxu3 %v1844_v32  ;;  %1003 = vmatpush.bf16.msrb.mxu1 %v1836_v33  ;;  %v1868_v17 = vor.u32 %v2082_v12, %v1865_v13  ;;  %v2117_v22 = vld [vmem:[%s2477_s12 + $0x16c] sm:$0xf]  ;;  %v2116_v25 = vld [vmem:[%s2477_s12 + $0x164] sm:$0xf]  ;;  %v2016_v27 = vor.u32 %v2133_v19, %v2015_v18  ;;  %v2008_v28 = vor.u32 %v2132_v21, %v2007_v20  ;;  %v1887_v30 = vld [vmem:[%s2477_s12 + $0x68] sm:$0xf] }
  0x4e   : > { %v2017_v24 = vld [vmem:[%s2477_s12 + $0x1e8] sm:$0xf0]  ;;  %v2009_v26 = vld [vmem:[%s2477_s12 + $0x1e0] sm:$0xf0]  ;;  %v2101_v31 = vld [vmem:[%s2477_s12 + $0xe4] sm:$0xf0] }
  0x4f   : > { %v2020_v29 = vor.u32 %v2117_v22, %v2017_v24  ;;  %v1879_v32 = vld [vmem:[%s2477_s12 + $0x60] sm:$0xf]  ;;  %v2012_v33 = vor.u32 %v2116_v25, %v2009_v26  ;;  %v2085_v35 = vld [vmem:[%s2477_s12 + $0x6c] sm:$0xf]  ;;  %v2084_v37 = vld [vmem:[%s2477_s12 + $0x64] sm:$0xf]  ;;  %v1888_v39 = vor.u32 %v2101_v31, %v1887_v30 }
  0x50   : > { %v2100_v34 = vld [vmem:[%s2477_s12 + $0xdc] sm:$0xf0]  ;;  %v1889_v36 = vld [vmem:[%s2477_s12 + $0xe8] sm:$0xf0]  ;;  %v1881_v38 = vld [vmem:[%s2477_s12 + $0xe0] sm:$0xf0] }
  0x51   : > { %v1880_v40 = vor.u32 %v2100_v34, %v1879_v32  ;;  %v1892_v41 = vor.u32 %v2085_v35, %v1889_v36  ;;  %v2023_v45 = vld [vmem:[%s2477_s12 + $0x170] sm:$0xf]  ;;  %v2119_v47 = vld [vmem:[%s2477_s12 + $0x17c] sm:$0xf]  ;;  %v2118_v49 = vld [vmem:[%s2477_s12 + $0x174] sm:$0xf] }
  0x52   : > { %v2134_v46 = vld [vmem:[%s2477_s12 + $0x1ec] sm:$0xf0]  ;;  %v2025_v50 = vld [vmem:[%s2477_s12 + $0x1f0] sm:$0xf0]  ;;  %v2087_v59 = vld [vmem:[%s2477_s12 + $0x7c] sm:$0xf] }
  0x53   : > { %v2024_v52 = vor.u32 %v2134_v46, %v2023_v45  ;;  %v2102_v58 = vld [vmem:[%s2477_s12 + $0xec] sm:$0xf0]  ;;  %v1905_v60 = vld [vmem:[%s2477_s12 + $0xf8] sm:$0xf0]  ;;  %v2086_v61 = vld [vmem:[%s2477_s12 + $0x74] sm:$0xf] }
  0x54   : > { %v1897_v62 = vld [vmem:[%s2477_s12 + $0xf0] sm:$0xf0]  ;;  %v1908_v1 = vor.u32 %v2087_v59, %v1905_v60  ;;  %v1342_v13 = vld [vmem:[%s2488_s30] sm:$0xff]  ;;  %s2694_s8 = scalar_lea.vmem [#allocation7], %s1778_s24  ;;  %p362_p13 = scmp.lt.s32.totalorder %s2341_s21, 2  ;;  %vm1619_vm1 = vcmask 7168  }
  0x55   : > { %v1352_v20 = vperm.slane %v1342_v13, 2  ;;  %v2697_v21 = vld [vmem:[%s2694_s8] sm:$0xff]  ;;  %v1353_v25 = vperm.slane %v1342_v13, 3  ;;  %v1354_v31 = vperm.slane %v1342_v13, 4  ;;  %v1356_v45 = vperm.slane %v1342_v13, 6 }
  0x56   : > { %2045 = vmatmul.msk.bf16.vlgmr.msra.gmra.mxu0 %vm823_vm0, %v2513_v23  ;;  %2046 = vmatmul.msk.bf16.vlgmr.msra.gmra.mxu1 %vm823_vm0, %v2513_v23  ;;  %v1486_v26 = vperm.slane %v2697_v21, 0  ;;  %v1487_v30 = vperm.slane %v2697_v21, 1  ;;  %v1488_v36 = vperm.slane %v2697_v21, 2  ;;  %s2831_s21 = smov (!%p362_p13, %s2341_s21), 2 }
  0x57   : > { %2047 = vmatmul.msk.bf16.vlgmr.msra.gmra.mxu2 %vm823_vm0, %v2513_v23  ;;  %1041 = vmatpush.bf16.msra.mxu0 %v1976_v43  ;;  %v2031_v43 = vld [vmem:[%s2477_s12 + $0x178] sm:$0xf]  ;;  %s364_s13 = scalar_lea.vmem %s2807_s4, %s2831_s21  ;;  %s1780_s14 = sshll.u32 %s2831_s21, 3 }
  0x58   : > { %2048 = vmatmul.msk.bf16.vlgmr.msra.gmra.mxu3 %vm823_vm0, %v2513_v23  ;;  %1067 = vmatpush.bf16.msra.mxu2 %v1984_v42  ;;  %v1884_v42 = vor.u32 %v2084_v37, %v1881_v38  ;;  %s368_s17 = scalar_lea.vmem %s2808_s5, %s1780_s14 }
  0x59   : > { %1080 = vmatpush.bf16.msra.mxu3 %v1988_v44  ;;  %1054 = vmatpush.bf16.msra.mxu1 %v1980_v48  ;;  %v2135_v44 = vld [vmem:[%s2477_s12 + $0x1f4] sm:$0xf0]  ;;  %v2033_v48 = vld [vmem:[%s2477_s12 + $0x1f8] sm:$0xf0] }
  0x5a   : > { %v2032_v51 = vor.u32 %v2135_v44, %v2031_v43  ;;  %v2036_v53 = vor.u32 %v2119_v47, %v2033_v48  ;;  %v1489_v44 = vperm.slane %v2697_v21, 3 }
  0x5b   : > { %1042 = vmatpush.bf16.msra.mxu0 %v1848_v55  ;;  %v2103_v55 = vld [vmem:[%s2477_s12 + $0xf4] sm:$0xf0] }
  0x5c   : > { %1068 = vmatpush.bf16.msra.mxu2 %v1856_v54  ;;  %v1903_v54 = vld [vmem:[%s2477_s12 + $0x78] sm:$0xf] }
  0x5d   : > { %1081 = vmatpush.bf16.msra.mxu3 %v1860_v56  ;;  %1055 = vmatpush.bf16.msra.mxu1 %v1852_v57  ;;  %v1895_v56 = vld [vmem:[%s2477_s12 + $0x70] sm:$0xf]  ;;  %v2028_v57 = vor.u32 %v2118_v49, %v2025_v50  ;;  %v1904_v63 = vor.u32 %v2103_v55, %v1903_v54  ;;  %v1490_v49 = vperm.slane %v2697_v21, 4 }
  0x5e   : > { %v1896_v0 = vor.u32 %v2102_v58, %v1895_v56  ;;  %v1357_v58 = vperm.slane %v1342_v13, 7 }
  0x66   : > { %2049 = vmatmul.msk.bf16.vlgmr.msrb.gmra.mxu0 %vm823_vm0, %v2513_v23  ;;  %2050 = vmatmul.msk.bf16.vlgmr.msrb.gmra.mxu1 %vm823_vm0, %v2513_v23 }
  0x67   : > { %2051 = vmatmul.msk.bf16.vlgmr.msrb.gmra.mxu2 %vm823_vm0, %v2513_v23  ;;  %1093 = vmatpush.bf16.msrb.mxu0 %v1992_v3 }
  0x68   : > { %2052 = vmatmul.msk.bf16.vlgmr.msrb.gmra.mxu3 %vm823_vm0, %v2513_v23  ;;  %1119 = vmatpush.bf16.msrb.mxu2 %v2000_v2  ;;  %v1900_v2 = vor.u32 %v2086_v61, %v1897_v62  ;;  %v1491_v61 = vperm.slane %v2697_v21, 5 }
  0x69   : > { %1132 = vmatpush.bf16.msrb.mxu3 %v2004_v4  ;;  %1106 = vmatpush.bf16.msrb.mxu1 %v1996_v8 }
  0x6b   : > { %1094 = vmatpush.bf16.msrb.mxu0 %v1864_v15  ;;  %v1350_v15 = vperm.slane %v1342_v13, 0 }
  0x6c   : > { %1120 = vmatpush.bf16.msrb.mxu2 %v1872_v14 }
  0x6d   : > { %1133 = vmatpush.bf16.msrb.mxu3 %v1876_v16  ;;  %1107 = vmatpush.bf16.msrb.mxu1 %v1868_v17  ;;  %v1351_v16 = vperm.slane %v1342_v13, 1 }
  0x76   : > { %2053 = vmatmul.msk.bf16.vlgmr.msra.gmra.mxu0 %vm823_vm0, %v2513_v23  ;;  %2054 = vmatmul.msk.bf16.vlgmr.msra.gmra.mxu1 %vm823_vm0, %v2513_v23 }
  0x77   : > { %2055 = vmatmul.msk.bf16.vlgmr.msra.gmra.mxu2 %vm823_vm0, %v2513_v23  ;;  %1145 = vmatpush.bf16.msra.mxu0 %v2008_v28 }
  0x78   : > { %2056 = vmatmul.msk.bf16.vlgmr.msra.gmra.mxu3 %vm823_vm0, %v2513_v23  ;;  %1171 = vmatpush.bf16.msra.mxu2 %v2016_v27 }
  0x79   : > { %1184 = vmatpush.bf16.msra.mxu3 %v2020_v29  ;;  %1158 = vmatpush.bf16.msra.mxu1 %v2012_v33 }
  0x7b   : > { %1146 = vmatpush.bf16.msra.mxu0 %v1880_v40 }
  0x7c   : > { %1172 = vmatpush.bf16.msra.mxu2 %v1888_v39 }
  0x7d   : > { %1185 = vmatpush.bf16.msra.mxu3 %v1892_v41  ;;  %1159 = vmatpush.bf16.msra.mxu1 %v1884_v42  ;;  %v1355_v41 = vperm.slane %v1342_v13, 5 }
  0x86   : > { %2057 = vmatmul.msk.bf16.vlgmr.msrb.gmra.mxu0 %vm823_vm0, %v2513_v23  ;;  %2058 = vmatmul.msk.bf16.vlgmr.msrb.gmra.mxu1 %vm823_vm0, %v2513_v23 }
  0x87   : > { %2059 = vmatmul.msk.bf16.vlgmr.msrb.gmra.mxu2 %vm823_vm0, %v2513_v23  ;;  %1197 = vmatpush.bf16.msrb.mxu0 %v2024_v52 }
  0x88   : > { %2060 = vmatmul.msk.bf16.vlgmr.msrb.gmra.mxu3 %vm823_vm0, %v2513_v23  ;;  %1223 = vmatpush.bf16.msrb.mxu2 %v2032_v51 }
  0x89   : > { %1236 = vmatpush.bf16.msrb.mxu3 %v2036_v53  ;;  %1210 = vmatpush.bf16.msrb.mxu1 %v2028_v57  ;;  %v2705_v53 = vld [vmem:[%s2488_s30 + $0x8] sm:$0xff] }
  0x8a   : > { %v1358_v62 = vperm.slane %v2705_v53, 0 }
  0x8b   : > { %1198 = vmatpush.bf16.msrb.mxu0 %v1896_v0 }
  0x8c   : > { %1224 = vmatpush.bf16.msrb.mxu2 %v1904_v63 }
  0x8d   : > { %1237 = vmatpush.bf16.msrb.mxu3 %v1908_v1  ;;  %1211 = vmatpush.bf16.msrb.mxu1 %v1900_v2  ;;  %v1492_v1 = vperm.slane %v2697_v21, 6 }
  0x96   : > { %2061 = vmatmul.msk.bf16.vlgmr.msra.gmra.mxu0 %vm823_vm0, %v2513_v23  ;;  %2062 = vmatmul.msk.bf16.vlgmr.msra.gmra.mxu1 %vm823_vm0, %v2513_v23 }
  0x97   : > { %2063 = vmatmul.msk.bf16.vlgmr.msra.gmra.mxu2 %vm823_vm0, %v2513_v23 }
  0x98   : > { %2064 = vmatmul.msk.bf16.vlgmr.msra.gmra.mxu3 %vm823_vm0, %v2513_v23 }
  0xa6   : > { %2065 = vmatmul.msk.bf16.vlgmr.msrb.gmra.mxu0 %vm823_vm0, %v2513_v23  ;;  %2066 = vmatmul.msk.bf16.vlgmr.msrb.gmra.mxu1 %vm823_vm0, %v2513_v23 }
  0xa7   : > { %2067 = vmatmul.msk.bf16.vlgmr.msrb.gmra.mxu2 %vm823_vm0, %v2513_v23 }
  0xa8   : > { %2068 = vmatmul.msk.bf16.vlgmr.msrb.gmra.mxu3 %vm823_vm0, %v2513_v23 }
  0xb3   : > { %v836_v3 = vpop.f32.mrf.mxu0  ;;  %v849_v4 = vpop.f32.mrf.mxu1 }
  0xb4   : > { %v1414_v23 = vadd.f32 %v1350_v15, %v836_v3  ;;  %v1415_v22 = vadd.f32 %v1351_v16, %v849_v4  ;;  %v1360_v15 = vperm.slane %v2705_v53, 2 }
  0xb6   : > { %v1446_v28 = vmax.f32 %v1414_v23, 0.0  ;;  %v1447_v29 = vmax.f32 %v1415_v22, 0.0 }
  0xb8   : > { %v1550_v38 = vmul.f32 %v1486_v26, %v1446_v28  ;;  %v1551_v39 = vmul.f32 %v1487_v30, %v1447_v29  ;;  %v1362_v29 = vperm.slane %v2705_v53, 4 }
  0xba   : > { %v862_v5 = vpop.f32.mrf.mxu2  ;;  %v1582_v47 = vadd.f32 %v1551_v39, %v1550_v38  ;;  %v1363_v39 = vperm.slane %v2705_v53, 5 }
  0xbb   : > { %v875_v6 = vpop.f32.mrf.mxu3  ;;  %v838_v7 = vpop.f32.mrf.mxu0  ;;  %v1416_v24 = vadd.f32 %v1352_v20, %v862_v5 }
  0xbc   : > { %v851_v8 = vpop.f32.mrf.mxu1  ;;  %v1417_v37 = vadd.f32 %v1353_v25, %v875_v6  ;;  %v1359_v7 = vperm.slane %v2705_v53, 1 }
  0xbd   : > { %v1448_v35 = vmax.f32 %v1416_v24, 0.0  ;;  %v1361_v24 = vperm.slane %v2705_v53, 3 }
  0xbe   : > { %v1449_v43 = vmax.f32 %v1417_v37, 0.0 }
  0xbf   : > { %v1552_v42 = vmul.f32 %v1488_v36, %v1448_v35 }
  0xc0   : > { %v1553_v56 = vmul.f32 %v1489_v44, %v1449_v43  ;;  %v1364_v43 = vperm.slane %v2705_v53, 6 }
  0xc1   : > { %v1583_v55 = vadd.f32 %v1582_v47, %v1552_v42 }
  0xc2   : > { %v864_v9 = vpop.f32.mrf.mxu2 }
  0xc3   : > { %v877_v10 = vpop.f32.mrf.mxu3  ;;  %v888_v11 = vpop.f32.mrf.mxu0  ;;  %v1584_v63 = vadd.f32 %v1583_v55, %v1553_v56 }
  0xc4   : > { %v901_v12 = vpop.f32.mrf.mxu1  ;;  %v1418_v40 = vadd.f32 %v1354_v31, %v888_v11  ;;  %v2712_v10 = vld [vmem:[%s2694_s8 + $0x8] sm:$0xff] }
  0xc5   : > { %v1419_v50 = vadd.f32 %v1355_v41, %v901_v12  ;;  %v1495_v28 = vperm.slane %v2712_v10, 1  ;;  %v1496_v35 = vperm.slane %v2712_v10, 2  ;;  %v1497_v42 = vperm.slane %v2712_v10, 3 }
  0xc6   : > { %v1450_v48 = vmax.f32 %v1418_v40, 0.0  ;;  %v1498_v47 = vperm.slane %v2712_v10, 4 }
  0xc7   : > { %v1451_v60 = vmax.f32 %v1419_v50, 0.0 }
  0xc8   : > { %v1554_v59 = vmul.f32 %v1490_v49, %v1450_v48 }
  0xc9   : > { %v1555_v5 = vmul.f32 %v1491_v61, %v1451_v60  ;;  %v1499_v60 = vperm.slane %v2712_v10, 5 }
  0xca   : > { %v914_v14 = vpop.f32.mrf.mxu2  ;;  %v1585_v4 = vadd.f32 %v1584_v63, %v1554_v59 }
  0xcb   : > { %v927_v17 = vpop.f32.mrf.mxu3  ;;  %v890_v18 = vpop.f32.mrf.mxu0  ;;  %v1420_v57 = vadd.f32 %v1356_v45, %v914_v14  ;;  %v1493_v14 = vperm.slane %v2697_v21, 7 }
  0xcc   : > { %v903_v19 = vpop.f32.mrf.mxu1  ;;  %v1421_v2 = vadd.f32 %v1357_v58, %v927_v17  ;;  %v1586_v16 = vadd.f32 %v1585_v4, %v1555_v5  ;;  %v1494_v17 = vperm.slane %v2712_v10, 0 }
  0xcd   : > { %v1452_v0 = vmax.f32 %v1420_v57, 0.0  ;;  %v1365_v57 = vperm.slane %v2705_v53, 7 }
  0xce   : > { %v1453_v13 = vmax.f32 %v1421_v2, 0.0 }
  0xcf   : > { %v1556_v12 = vmul.f32 %v1492_v1, %v1452_v0  ;;  %v1500_v0 = vperm.slane %v2712_v10, 6 }
  0xd0   : > { %v1557_v23 = vmul.f32 %v1493_v14, %v1453_v13  ;;  %v1501_v13 = vperm.slane %v2712_v10, 7 }
  0xd1   : > { %v1587_v20 = vadd.f32 %v1586_v16, %v1556_v12 }
  0xd2   : > { %v916_v27 = vpop.f32.mrf.mxu2 }
  0xd3   : > { %v929_v32 = vpop.f32.mrf.mxu3  ;;  %v940_v33 = vpop.f32.mrf.mxu0 }
  0xd4   : > { %v953_v34 = vpop.f32.mrf.mxu1  ;;  %v1422_v6 = vadd.f32 %v1358_v62, %v940_v33  ;;  %v1588_v32 = vadd.f32 %v1587_v20, %v1557_v23 }
  0xd5   : > { %v1423_v19 = vadd.f32 %v1359_v7, %v953_v34 }
  0xd6   : > { %v1454_v18 = vmax.f32 %v1422_v6, 0.0 }
  0xd7   : > { %v1455_v27 = vmax.f32 %v1423_v19, 0.0 }
  0xd8   : > { %v1558_v26 = vmul.f32 %v1494_v17, %v1454_v18 }
  0xd9   : > { %v1559_v37 = vmul.f32 %v1495_v28, %v1455_v27 }
  0xda   : > { %v966_v46 = vpop.f32.mrf.mxu2  ;;  %v1589_v36 = vadd.f32 %v1588_v32, %v1558_v26 }
  0xdb   : > { %v979_v51 = vpop.f32.mrf.mxu3  ;;  %v942_v52 = vpop.f32.mrf.mxu0  ;;  %v1424_v22 = vadd.f32 %v1360_v15, %v966_v46 }
  0xdc   : > { %v955_v54 = vpop.f32.mrf.mxu1  ;;  %v1425_v34 = vadd.f32 %v1361_v24, %v979_v51  ;;  %v1590_v45 = vadd.f32 %v1589_v36, %v1559_v37  ;;  %v2726_v51 = vld [vmem:[%s2488_s30 + $0x10] sm:$0xff] }
  0xdd   : > { %v1456_v33 = vmax.f32 %v1424_v22, 0.0  ;;  %v1366_v61 = vperm.slane %v2726_v51, 0  ;;  %v1367_v6 = vperm.slane %v2726_v51, 1  ;;  %v1368_v14 = vperm.slane %v2726_v51, 2 }
  0xde   : > { %v1457_v41 = vmax.f32 %v1425_v34, 0.0  ;;  %v1369_v22 = vperm.slane %v2726_v51, 3  ;;  %v1370_v10 = vperm.slane %v2726_v51, 4  ;;  %v1371_v37 = vperm.slane %v2726_v51, 5 }
  0xdf   : > { %v1560_v40 = vmul.f32 %v1496_v35, %v1456_v33 }
  0xe0   : > { %v1561_v55 = vmul.f32 %v1497_v42, %v1457_v41  ;;  %v1372_v41 = vperm.slane %v2726_v51, 6 }
  0xe1   : > { %v1591_v54 = vadd.f32 %v1590_v45, %v1560_v40 }
  0xe2   : > { %v968_v3 = vpop.f32.mrf.mxu2 }
  0xe3   : > { %v981_v8 = vpop.f32.mrf.mxu3  ;;  %v992_v9 = vpop.f32.mrf.mxu0  ;;  %v1592_v62 = vadd.f32 %v1591_v54, %v1561_v55  ;;  %v1373_v55 = vperm.slane %v2726_v51, 7 }
  0xe4   : > { %v1005_v11 = vpop.f32.mrf.mxu1  ;;  %v1426_v38 = vadd.f32 %v1362_v29, %v992_v9  ;;  %v2734_v8 = vld [vmem:[%s2694_s8 + $0x10] sm:$0xff] }
  0xe5   : > { %v1427_v48 = vadd.f32 %v1363_v39, %v1005_v11  ;;  %v1502_v18 = vperm.slane %v2734_v8, 0  ;;  %v1503_v27 = vperm.slane %v2734_v8, 1  ;;  %v1504_v32 = vperm.slane %v2734_v8, 2 }
  0xe6   : > { %v1458_v46 = vmax.f32 %v1426_v38, 0.0  ;;  %v1505_v40 = vperm.slane %v2734_v8, 3  ;;  %v1506_v45 = vperm.slane %v2734_v8, 4 }
  0xe7   : > { %v1459_v59 = vmax.f32 %v1427_v48, 0.0 }
  0xe8   : > { %v1562_v58 = vmul.f32 %v1498_v47, %v1458_v46 }
  0xe9   : > { %v1563_v4 = vmul.f32 %v1499_v60, %v1459_v59  ;;  %v1507_v59 = vperm.slane %v2734_v8, 5 }
  0xea   : > { %v1018_v25 = vpop.f32.mrf.mxu2  ;;  %v1593_v3 = vadd.f32 %v1592_v62, %v1562_v58 }
  0xeb   : > { %v1031_v21 = vpop.f32.mrf.mxu3  ;;  %v994_v30 = vpop.f32.mrf.mxu0  ;;  %v1428_v56 = vadd.f32 %v1364_v43, %v1018_v25 }
  0xec   : > { %v1007_v31 = vpop.f32.mrf.mxu1  ;;  %v1429_v1 = vadd.f32 %v1365_v57, %v1031_v21  ;;  %v1594_v15 = vadd.f32 %v1593_v3, %v1563_v4 }
  0xed   : > { %v1460_v63 = vmax.f32 %v1428_v56, 0.0  ;;  %v2750_v56 = vld [vmem:[%s2488_s30 + $0x18] sm:$0xff] }
  0xee   : > { %v1461_v12 = vmax.f32 %v1429_v1, 0.0  ;;  %v1374_v60 = vperm.slane %v2750_v56, 0 }
  0xef   : > { %v1564_v11 = vmul.f32 %v1500_v0, %v1460_v63  ;;  %v1508_v63 = vperm.slane %v2734_v8, 6 }
  0xf0   : > { %v1565_v20 = vmul.f32 %v1501_v13, %v1461_v12  ;;  %v1509_v12 = vperm.slane %v2734_v8, 7  ;;  %v1615_v13 = vld [vmem:[%s364_s13] sm:$0x1] }
  0xf1   : > { %v1595_v19 = vadd.f32 %v1594_v15, %v1564_v11  ;;  %2136 = vpush %v1615_v13 }
  0xf2   : > { %v1020_v44 = vpop.f32.mrf.mxu2 }
  0xf3   : > { %v1033_v49 = vpop.f32.mrf.mxu3  ;;  %v1044_v50 = vpop.f32.mrf.mxu0  ;;  %v1596_v30 = vadd.f32 %v1595_v19, %v1565_v20 }
  0xf4   : > { %v1057_v52 = vpop.f32.mrf.mxu1  ;;  %v1430_v5 = vadd.f32 %v1366_v61, %v1044_v50 }
  0xf5   : > { %v1431_v17 = vadd.f32 %v1367_v6, %v1057_v52  ;;  %v1375_v6 = vperm.slane %v2750_v56, 1 }
  0xf6   : > { %v1462_v16 = vmax.f32 %v1430_v5, 0.0  ;;  %v2763_v5 = vld [vmem:[%s2694_s8 + $0x18] sm:$0xff] }
  0xf7   : > { %v1463_v26 = vmax.f32 %v1431_v17, 0.0  ;;  %v1376_v17 = vperm.slane %v2750_v56, 2 }
  0xf8   : > { %v1566_v25 = vmul.f32 %v1502_v18, %v1462_v16 }
  0xf9   : > { %v1567_v34 = vmul.f32 %v1503_v27, %v1463_v26  ;;  %v1511_v26 = vperm.slane %v2763_v5, 1 }
  0xfa   : > { %v1070_v2 = vpop.f32.mrf.mxu2  ;;  %v1597_v35 = vadd.f32 %v1596_v30, %v1566_v25  ;;  %v1512_v30 = vperm.slane %v2763_v5, 2 }
  0xfb   : > { %v1083_v7 = vpop.f32.mrf.mxu3  ;;  %v1046_v53 = vpop.f32.mrf.mxu0  ;;  %v1432_v23 = vadd.f32 %v1368_v14, %v1070_v2  ;;  %v1510_v14 = vperm.slane %v2763_v5, 0 }
  0xfc   : > { %v1059_v9 = vpop.f32.mrf.mxu1  ;;  %v1433_v33 = vadd.f32 %v1369_v22, %v1083_v7  ;;  %v1598_v43 = vadd.f32 %v1597_v35, %v1567_v34  ;;  %v1378_v35 = vperm.slane %v2750_v56, 4 }
  0xfd   : > { %v1464_v31 = vmax.f32 %v1432_v23, 0.0  ;;  %v1377_v23 = vperm.slane %v2750_v56, 3 }
  0xfe   : > { %v1465_v39 = vmax.f32 %v1433_v33, 0.0 }
  0xff   : > { %v1568_v38 = vmul.f32 %v1504_v32, %v1464_v31 }
 0x100   : > { %v1569_v52 = vmul.f32 %v1505_v40, %v1465_v39 }
 0x101   : > { %v1599_v50 = vadd.f32 %v1598_v43, %v1568_v38  ;;  %v1379_v38 = vperm.slane %v2750_v56, 5 }
 0x102   : > { %v1072_v24 = vpop.f32.mrf.mxu2 }
 0x103   : > { %v1085_v28 = vpop.f32.mrf.mxu3  ;;  %v1096_v29 = vpop.f32.mrf.mxu0  ;;  %v1600_v61 = vadd.f32 %v1599_v50, %v1569_v52  ;;  %v1515_v52 = vperm.slane %v2763_v5, 5 }
 0x104   : > { %v1109_v21 = vpop.f32.mrf.mxu1  ;;  %v1434_v36 = vadd.f32 %v1370_v10, %v1096_v29 }
 0x105   : > { %v1435_v46 = vadd.f32 %v1371_v37, %v1109_v21  ;;  %v1513_v37 = vperm.slane %v2763_v5, 3 }
 0x106   : > { %v1466_v44 = vmax.f32 %v1434_v36, 0.0 }
 0x107   : > { %v1467_v58 = vmax.f32 %v1435_v46, 0.0 }
 0x108   : > { %v1570_v57 = vmul.f32 %v1506_v45, %v1466_v44  ;;  %v1514_v44 = vperm.slane %v2763_v5, 4 }
 0x109   : > { %v1571_v2 = vmul.f32 %v1507_v59, %v1467_v58 }
 0x10a   : > { %v1122_v42 = vpop.f32.mrf.mxu2  ;;  %v1601_v51 = vadd.f32 %v1600_v61, %v1570_v57  ;;  %v1381_v57 = vperm.slane %v2750_v56, 7 }
 0x10b   : > { %v1135_v47 = vpop.f32.mrf.mxu3  ;;  %v1098_v48 = vpop.f32.mrf.mxu0  ;;  %v1436_v54 = vadd.f32 %v1372_v41, %v1122_v42 }
 0x10c   : > { %v1111_v49 = vpop.f32.mrf.mxu1  ;;  %v1437_v0 = vadd.f32 %v1373_v55, %v1135_v47  ;;  %v1602_v15 = vadd.f32 %v1601_v51, %v1571_v2 }
 0x10d   : > { %v1468_v62 = vmax.f32 %v1436_v54, 0.0  ;;  %v1380_v54 = vperm.slane %v2750_v56, 6 }
 0x10e   : > { %v1469_v11 = vmax.f32 %v1437_v0, 0.0 }
 0x10f   : > { %v1572_v9 = vmul.f32 %v1508_v63, %v1468_v62  ;;  %v1516_v63 = vperm.slane %v2763_v5, 6 }
 0x110   : > { %v1573_v20 = vmul.f32 %v1509_v12, %v1469_v11 }
 0x111   : > { %v1603_v19 = vadd.f32 %v1602_v15, %v1572_v9 }
 0x112   : > { %v1124_v1 = vpop.f32.mrf.mxu2 }
 0x113   : > { %v1137_v3 = vpop.f32.mrf.mxu3  ;;  %v1148_v4 = vpop.f32.mrf.mxu0  ;;  %v1604_v10 = vadd.f32 %v1603_v19, %v1573_v20 }
 0x114   : > { %v1438_v7 = vadd.f32 %v1374_v60, %v1148_v4  ;;  %v1161_v53 = vpop.f32.mrf.mxu1  ;;  %v1517_v3 = vperm.slane %v2763_v5, 7 }
 0x115   : > { %v1439_v18 = vadd.f32 %v1375_v6, %v1161_v53 }
 0x116   : > { %v1470_v16 = vmax.f32 %v1438_v7, 0.0 }
 0x117   : > { %v1471_v25 = vmax.f32 %v1439_v18, 0.0 }
 0x118   : > { %v1574_v24 = vmul.f32 %v1510_v14, %v1470_v16 }
 0x119   : > { %v1575_v33 = vmul.f32 %v1511_v26, %v1471_v25 }
 0x11a   : > { %v1174_v22 = vpop.f32.mrf.mxu2  ;;  %v1605_v32 = vadd.f32 %v1604_v10, %v1574_v24 }
 0x11b   : > { %v1440_v27 = vadd.f32 %v1376_v17, %v1174_v22  ;;  %v1187_v8 = vpop.f32.mrf.mxu3  ;;  %v1150_v28 = vpop.f32.mrf.mxu0 }
 0x11c   : > { %v1163_v29 = vpop.f32.mrf.mxu1  ;;  %v1441_v31 = vadd.f32 %v1377_v23, %v1187_v8  ;;  %v1606_v40 = vadd.f32 %v1605_v32, %v1575_v33 }
 0x11d   : > { %v1472_v21 = vmax.f32 %v1440_v27, 0.0 }
 0x11e   : > { %v1473_v36 = vmax.f32 %v1441_v31, 0.0 }
 0x11f   : > { %v1576_v34 = vmul.f32 %v1512_v30, %v1472_v21 }
 0x120   : > { %v1577_v47 = vmul.f32 %v1513_v37, %v1473_v36 }
 0x121   : > { %v1607_v46 = vadd.f32 %v1606_v40, %v1576_v34 }
 0x122   : > { %v1176_v39 = vpop.f32.mrf.mxu2  ;;  %s2137_s7 = spop %2136 }
 0x123   : > { %v1189_v41 = vpop.f32.mrf.mxu3  ;;  %v1200_v42 = vpop.f32.mrf.mxu0  ;;  %v1608_v58 = vadd.f32 %v1607_v46, %v1577_v47  ;;  %v1617_v14 = vstv %s2137_s7 }
 0x124   : > { %v1442_v43 = vadd.f32 %v1378_v35, %v1200_v42  ;;  %v1213_v45 = vpop.f32.mrf.mxu1 }
 0x125   : > { %v1443_v48 = vadd.f32 %v1379_v38, %v1213_v45 }
 0x126   : > { %v1474_v49 = vmax.f32 %v1442_v43, 0.0 }
 0x127   : > { %v1475_v50 = vmax.f32 %v1443_v48, 0.0 }
 0x128   : > { %v1578_v55 = vmul.f32 %v1514_v44, %v1474_v49 }
 0x129   : > { %v1579_v61 = vmul.f32 %v1515_v52, %v1475_v50 }
 0x12a   : > { %v1226_v59 = vpop.f32.mrf.mxu2  ;;  %v1609_v60 = vadd.f32 %v1608_v58, %v1578_v55 }
 0x12b   : > { %v1444_v62 = vadd.f32 %v1380_v54, %v1226_v59  ;;  %v1239_v0 = vpop.f32.mrf.mxu3  ;;  %v1202_v1 = vpop.f32.mrf.mxu0 }
 0x12c   : > { %v1445_v51 = vadd.f32 %v1381_v57, %v1239_v0  ;;  %v1215_v2 = vpop.f32.mrf.mxu1  ;;  %v1610_v53 = vadd.f32 %v1609_v60, %v1579_v61 }
 0x12d   : > { %v1476_v4 = vmax.f32 %v1444_v62, 0.0 }
 0x12e   : > { %v1477_v6 = vmax.f32 %v1445_v51, 0.0 }
 0x12f   : > { %v1580_v7 = vmul.f32 %v1516_v63, %v1476_v4 }
 0x130   : > { %v1581_v9 = vmul.f32 %v1517_v3, %v1477_v6 }
 0x131   : > { %v1611_v56 = vadd.f32 %v1610_v53, %v1580_v7 }
 0x132   : > { %v1228_v11 = vpop.f32.mrf.mxu2 }
 0x133   : > { %v1241_v12 = vpop.f32.mrf.mxu3  ;;  %v1612_v13 = vadd.f32 %v1611_v56, %v1581_v9 }
 0x135   : > { %1613 = vadd.xlane.f32.xlu0 %v1612_v13 }
 0x1a8   : > { %v1614_v15 = vpop.xlane.xlu0 %1613 }
 0x1a9   : > { %v1618_v5 = vadd.f32 %v1617_v14, %v1614_v15 }
 0x1ab   : > { %1620 = vst.msk [vmem:[%s368_s17] sm:$0xff] %vm1619_vm1, %v1618_v5 }
 0x1ac PF: > { %s21_s23 = sadd.s32 1, %s2349_s23   ;;  %s2822_s10 = sld [smem:[#allocation10_spill]] }
 0x1ad   : > { %p18_p0 = scmp.ge.s32.totalorder %s21_s23, 5   ;;  %s2823_s18 = smov %s2333_s19 }
 0x1ae   : > { %s2824_s19 = smov %s2337_s20  ;;  %s2825_s20 = smov %s2430_s29 }
 0x1af   : > { %s2826_s21 = smov %s2345_s22  ;;  %20 = sbr.rel (!%p18_p0) target bundleno = 9 (0x9), region = 118 }
 0x1b2   : > { %s2827_s22 = smov %s2822_s10 }
 0x1b4   :  { %1640 = vsyncpa [#allocation4], 1 }
 0x1b5   :  { %1642 = vsyncpa [#allocation4 + $0x1], 1 }
 0x1b6   :  { %1643 = vsyncpa [#allocation6], 1 }
 0x1b7   :  { %1645 = vsyncpa [#allocation6 + $0x1], 1 }

</bundles_post_ra>
